<compile_context>
chip_gen: v7x
topology: tpu7x:2x2x1
jax: 0.10.0
libtpu: 0.0.40
codegen_flags: <defaults>
</compile_context>

<pallas_src>
import functools

import jax
import jax.numpy as jnp
from jax import lax
from jax.experimental import pallas as pl
from jax.experimental.pallas import tpu as pltpu


def _rnn_relu_kernel(x_ref, h0_ref, wih_ref, whh_ref, y_ref, h_scratch):
    """One grid step == one chunk of `T_c` timesteps.

    x_ref  : (T_c, B, I)   current chunk of inputs (VMEM)
    h0_ref : (1, B, H)     initial hidden state
    wih_ref: (I, H)        W_ih^T  (pre-transposed)
    whh_ref: (H, H)        W_hh^T  (pre-transposed)
    y_ref  : (T_c, B, H)   current chunk of outputs
    h_scratch: (B, H) f32  hidden state carried across grid steps
    """
    # Initialize the carried hidden state from h_0 on the very first chunk.
    @pl.when(pl.program_id(0) == 0)
    def _():
        h_scratch[...] = h0_ref[0].astype(jnp.float32)

    T_c, B, I = x_ref.shape
    H = whh_ref.shape[1]

    # ---- Phase 1: hoisted input projection (one big MXU matmul per chunk) --
    x_flat = x_ref[...].reshape(T_c * B, I).astype(jnp.float32)   # (T_c*B, I)
    gi = jnp.dot(x_flat, wih_ref[...].astype(jnp.float32),
                 preferred_element_type=jnp.float32)              # (T_c*B, H)

    # ---- Phase 2: recurrence (only the h-dependent matmul per step) --------
    whh = whh_ref[...].astype(jnp.float32)                        # (H, H)
    h = h_scratch[...]                                            # (B, H) f32
    for t in range(T_c):  # static unroll: T_c is a small compile-time chunk
        pre = gi[t * B:(t + 1) * B, :] + jnp.dot(
            h, whh, preferred_element_type=jnp.float32)
        h = jnp.maximum(pre, 0.0)          # nonlinearity='relu', bias=False
        y_ref[t] = h.astype(y_ref.dtype)   # stays in the VMEM output block

    h_scratch[...] = h                     # carry into the next chunk


@functools.partial(jax.jit, static_argnames=("chunk",))
def urnn_forward(x, h0, w_ih_t, w_hh_t, *, chunk):
    """uRNN.forward == nn.RNN(relu, 1 layer, no bias).forward.

    x      : (S, B, I)  time-major input (same layout as PyTorch RNN)
    h0     : (1, B, H)  initial hidden state
    w_ih_t : (I, H)     weight_ih_l0 pre-transposed (done once, outside)
    w_hh_t : (H, H)     weight_hh_l0 pre-transposed
    chunk  : timesteps processed per grid step (must divide S)

    returns (output, h_n) with output: (S, B, H), h_n: (1, B, H)
    """
    S, B, I = x.shape
    H = w_hh_t.shape[1]
    assert S % chunk == 0, "chunk must divide the sequence length"

    grid_spec = pltpu.PrefetchScalarGridSpec(
        num_scalar_prefetch=0,
        grid=(S // chunk,),
        in_specs=[
            pl.BlockSpec((chunk, B, I), lambda c: (c, 0, 0)),  # x chunk
            pl.BlockSpec((1, B, H), lambda c: (0, 0, 0)),      # h_0 (constant)
            pl.BlockSpec((I, H), lambda c: (0, 0)),            # W_ih^T (constant)
            pl.BlockSpec((H, H), lambda c: (0, 0)),            # W_hh^T (constant)
        ],
        out_specs=pl.BlockSpec((chunk, B, H), lambda c: (c, 0, 0)),  # y chunk
        scratch_shapes=[pltpu.VMEM((B, H), jnp.float32)],            # carried h
    )

    y = pl.pallas_call(
        _rnn_relu_kernel,
        out_shape=jax.ShapeDtypeStruct((S, B, H), x.dtype),
        grid_spec=grid_spec,
        compiler_params=pltpu.CompilerParams(
            # Sequential recurrence over time: the chunk axis carries state.
            dimension_semantics=("arbitrary",)),
    )(x, h0, w_ih_t, w_hh_t)

    # output_t == h_t for a single-layer unidirectional RNN, so h_n = y[-1:].
    h_n = y[-1:, :, :]
    return y, h_n


def urnn_reference(x, h0, w_ih, w_hh):
    """Pure-JAX reference matching torch.nn.RNN (relu, 1 layer, no bias)."""
    def step(h, x_t):
        h_new = jnp.maximum(x_t @ w_ih.T + h @ w_hh.T, 0.0)
        return h_new, h_new

    h_last, ys = lax.scan(step, h0[0], x)
    return ys, h_last[None]


if __name__ == "__main__":
    # Small shapes consistent with the module's forward.
    seq_len, batch, input_size, hidden_size = 8, 8, 32, 32
    chunk = 4  # 2 grid steps; hidden state carried across chunks

    key = jax.random.PRNGKey(0)
    k_x, k_h, k_wih, k_whh = jax.random.split(key, 4)

    # Deterministic parameter init mirroring nn.RNN's U(-1/sqrt(H), 1/sqrt(H)).
    bound = 1.0 / jnp.sqrt(jnp.float32(hidden_size))
    w_ih = jax.random.uniform(k_wih, (hidden_size, input_size),
                              jnp.float32, -bound, bound)   # weight_ih_l0
    w_hh = jax.random.uniform(k_whh, (hidden_size, hidden_size),
                              jnp.float32, -bound, bound)   # weight_hh_l0
    # NOTE: uRNN also owns B = zeros((H, H)); it is unused in forward().

    # Pre-transpose weights once (not per forward call).
    w_ih_t = jnp.asarray(w_ih.T)   # (I, H)
    w_hh_t = jnp.asarray(w_hh.T)   # (H, H)

    x = jax.random.normal(k_x, (seq_len, batch, input_size), jnp.float32)
    h0 = jax.random.normal(k_h, (1, batch, hidden_size), jnp.float32)

    y, h_n = urnn_forward(x, h0, w_ih_t, w_hh_t, chunk=chunk)
    jax.block_until_ready((y, h_n))

    y_ref, hn_ref = urnn_reference(x, h0, w_ih, w_hh)
    assert jnp.allclose(y, y_ref, atol=1e-5, rtol=1e-5), "output mismatch"
    assert jnp.allclose(h_n, hn_ref, atol=1e-5, rtol=1e-5), "h_n mismatch"

    print("KERNEL_OK")
</pallas_src>

<mosaic_0001>
module attributes {stable_mosaic.version = 11 : i64} {
  func.func @_rnn_relu_kernel(%arg0: i32, %arg1: memref<4x8x32xf32, #tpu.memory_space<vmem>>, %arg2: memref<1x8x32xf32, #tpu.memory_space<vmem>>, %arg3: memref<32x32xf32, #tpu.memory_space<vmem>>, %arg4: memref<32x32xf32, #tpu.memory_space<vmem>>, %arg5: memref<4x8x32xf32, #tpu.memory_space<vmem>>, %arg6: memref<8x32xf32, #tpu.memory_space<vmem>>) attributes {dimension_semantics = [#tpu.dimension_semantics<arbitrary>], iteration_bounds = array<i64: 2>, scalar_prefetch = 0 : i64, scratch_operands = 1 : i64, tpu.core_type = #tpu.core_type<tc>, window_params = [{transform_indices = @transform_0, window_bounds = array<i64: 4, 8, 32>}, {pipeline_mode = #tpu.pipeline_mode<synchronous>, transform_indices = @transform_1, window_bounds = array<i64: 1, 8, 32>}, {pipeline_mode = #tpu.pipeline_mode<synchronous>, transform_indices = @transform_2, window_bounds = array<i64: 32, 32>}, {pipeline_mode = #tpu.pipeline_mode<synchronous>, transform_indices = @transform_3, window_bounds = array<i64: 32, 32>}, {transform_indices = @transform_4, window_bounds = array<i64: 4, 8, 32>}]} {
    %c0_i32 = arith.constant 0 : i32
    %0 = arith.cmpi eq, %arg0, %c0_i32 : i32
    %1 = arith.extui %0 : i1 to i32
    %c0_i32_0 = arith.constant 0 : i32
    %2 = arith.cmpi ne, %1, %c0_i32_0 : i32
    scf.if %2 {
      %c0_28 = arith.constant 0 : index
      %c0_29 = arith.constant 0 : index
      %c0_30 = arith.constant 0 : index
      %42 = vector.load %arg2[%c0_28, %c0_29, %c0_30] : memref<1x8x32xf32, #tpu.memory_space<vmem>>, vector<1x8x32xf32>
      %43 = vector.shape_cast %42 : vector<1x8x32xf32> to vector<8x32xf32>
      %c0_31 = arith.constant 0 : index
      %c0_32 = arith.constant 0 : index
      %44 = vector.load %arg6[%c0_31, %c0_32] : memref<8x32xf32, #tpu.memory_space<vmem>>, vector<8x32xf32>
      tpu.vector_store %arg6[%c0_31, %c0_32], %43 {strides = array<i32>} : memref<8x32xf32, #tpu.memory_space<vmem>>, vector<8x32xf32>,
    } else {
    }
    %c0 = arith.constant 0 : index
    %c0_1 = arith.constant 0 : index
    %c0_2 = arith.constant 0 : index
    %3 = vector.load %arg1[%c0, %c0_1, %c0_2] : memref<4x8x32xf32, #tpu.memory_space<vmem>>, vector<4x8x32xf32>
    %4 = vector.shape_cast %3 : vector<4x8x32xf32> to vector<32x32xf32>
    %c0_3 = arith.constant 0 : index
    %c0_4 = arith.constant 0 : index
    %5 = vector.load %arg3[%c0_3, %c0_4] : memref<32x32xf32, #tpu.memory_space<vmem>>, vector<32x32xf32>
    %cst = arith.constant dense<0.000000e+00> : vector<32x32xf32>
    %6 = tpu.matmul %4, %5, %cst {dimension_numbers = #tpu.dot_dimension_numbers<[1], [0], [0], [1], [0, 0, 1, 1], [], []>} : vector<32x32xf32>, vector<32x32xf32>, vector<32x32xf32> -> vector<32x32xf32>
    %c0_5 = arith.constant 0 : index
    %c0_6 = arith.constant 0 : index
    %7 = vector.load %arg4[%c0_5, %c0_6] : memref<32x32xf32, #tpu.memory_space<vmem>>, vector<32x32xf32>
    %c0_7 = arith.constant 0 : index
    %c0_8 = arith.constant 0 : index
    %8 = vector.load %arg6[%c0_7, %c0_8] : memref<8x32xf32, #tpu.memory_space<vmem>>, vector<8x32xf32>
    %9 = vector.extract_strided_slice %6 {offsets = [0, 0], sizes = [8, 32], strides = [1, 1]} : vector<32x32xf32> to vector<8x32xf32>
    %cst_9 = arith.constant dense<0.000000e+00> : vector<8x32xf32>
    %10 = tpu.matmul %8, %7, %cst_9 {dimension_numbers = #tpu.dot_dimension_numbers<[1], [0], [0], [1], [0, 0, 1, 1], [], []>} : vector<8x32xf32>, vector<32x32xf32>, vector<8x32xf32> -> vector<8x32xf32>
    %11 = arith.addf %9, %10 : vector<8x32xf32>
    %cst_10 = arith.constant 0.000000e+00 : f32
    %12 = vector.broadcast %cst_10 : f32 to vector<8x32xf32>
    %13 = arith.maximumf %11, %12 : vector<8x32xf32>
    %c0_11 = arith.constant 0 : index
    %c0_12 = arith.constant 0 : index
    %c0_13 = arith.constant 0 : index
    %14 = vector.load %arg5[%c0_11, %c0_12, %c0_13] : memref<4x8x32xf32, #tpu.memory_space<vmem>>, vector<1x8x32xf32>
    %15 = vector.shape_cast %14 : vector<1x8x32xf32> to vector<8x32xf32>
    %16 = vector.shape_cast %13 : vector<8x32xf32> to vector<1x8x32xf32>
    tpu.vector_store %arg5[%c0_11, %c0_12, %c0_13], %16 {strides = array<i32>} : memref<4x8x32xf32, #tpu.memory_space<vmem>>, vector<1x8x32xf32>,
    %17 = vector.extract_strided_slice %6 {offsets = [8, 0], sizes = [8, 32], strides = [1, 1]} : vector<32x32xf32> to vector<8x32xf32>
    %cst_14 = arith.constant dense<0.000000e+00> : vector<8x32xf32>
    %18 = tpu.matmul %13, %7, %cst_14 {dimension_numbers = #tpu.dot_dimension_numbers<[1], [0], [0], [1], [0, 0, 1, 1], [], []>} : vector<8x32xf32>, vector<32x32xf32>, vector<8x32xf32> -> vector<8x32xf32>
    %19 = arith.addf %17, %18 : vector<8x32xf32>
    %cst_15 = arith.constant 0.000000e+00 : f32
    %20 = vector.broadcast %cst_15 : f32 to vector<8x32xf32>
    %21 = arith.maximumf %19, %20 : vector<8x32xf32>
    %c1 = arith.constant 1 : index
    %c0_16 = arith.constant 0 : index
    %c0_17 = arith.constant 0 : index
    %22 = vector.load %arg5[%c1, %c0_16, %c0_17] : memref<4x8x32xf32, #tpu.memory_space<vmem>>, vector<1x8x32xf32>
    %23 = vector.shape_cast %22 : vector<1x8x32xf32> to vector<8x32xf32>
    %24 = vector.shape_cast %21 : vector<8x32xf32> to vector<1x8x32xf32>
    tpu.vector_store %arg5[%c1, %c0_16, %c0_17], %24 {strides = array<i32>} : memref<4x8x32xf32, #tpu.memory_space<vmem>>, vector<1x8x32xf32>,
    %25 = vector.extract_strided_slice %6 {offsets = [16, 0], sizes = [8, 32], strides = [1, 1]} : vector<32x32xf32> to vector<8x32xf32>
    %cst_18 = arith.constant dense<0.000000e+00> : vector<8x32xf32>
    %26 = tpu.matmul %21, %7, %cst_18 {dimension_numbers = #tpu.dot_dimension_numbers<[1], [0], [0], [1], [0, 0, 1, 1], [], []>} : vector<8x32xf32>, vector<32x32xf32>, vector<8x32xf32> -> vector<8x32xf32>
    %27 = arith.addf %25, %26 : vector<8x32xf32>
    %cst_19 = arith.constant 0.000000e+00 : f32
    %28 = vector.broadcast %cst_19 : f32 to vector<8x32xf32>
    %29 = arith.maximumf %27, %28 : vector<8x32xf32>
    %c2 = arith.constant 2 : index
    %c0_20 = arith.constant 0 : index
    %c0_21 = arith.constant 0 : index
    %30 = vector.load %arg5[%c2, %c0_20, %c0_21] : memref<4x8x32xf32, #tpu.memory_space<vmem>>, vector<1x8x32xf32>
    %31 = vector.shape_cast %30 : vector<1x8x32xf32> to vector<8x32xf32>
    %32 = vector.shape_cast %29 : vector<8x32xf32> to vector<1x8x32xf32>
    tpu.vector_store %arg5[%c2, %c0_20, %c0_21], %32 {strides = array<i32>} : memref<4x8x32xf32, #tpu.memory_space<vmem>>, vector<1x8x32xf32>,
    %33 = vector.extract_strided_slice %6 {offsets = [24, 0], sizes = [8, 32], strides = [1, 1]} : vector<32x32xf32> to vector<8x32xf32>
    %cst_22 = arith.constant dense<0.000000e+00> : vector<8x32xf32>
    %34 = tpu.matmul %29, %7, %cst_22 {dimension_numbers = #tpu.dot_dimension_numbers<[1], [0], [0], [1], [0, 0, 1, 1], [], []>} : vector<8x32xf32>, vector<32x32xf32>, vector<8x32xf32> -> vector<8x32xf32>
    %35 = arith.addf %33, %34 : vector<8x32xf32>
    %cst_23 = arith.constant 0.000000e+00 : f32
    %36 = vector.broadcast %cst_23 : f32 to vector<8x32xf32>
    %37 = arith.maximumf %35, %36 : vector<8x32xf32>
    %c3 = arith.constant 3 : index
    %c0_24 = arith.constant 0 : index
    %c0_25 = arith.constant 0 : index
    %38 = vector.load %arg5[%c3, %c0_24, %c0_25] : memref<4x8x32xf32, #tpu.memory_space<vmem>>, vector<1x8x32xf32>
    %39 = vector.shape_cast %38 : vector<1x8x32xf32> to vector<8x32xf32>
    %40 = vector.shape_cast %37 : vector<8x32xf32> to vector<1x8x32xf32>
    tpu.vector_store %arg5[%c3, %c0_24, %c0_25], %40 {strides = array<i32>} : memref<4x8x32xf32, #tpu.memory_space<vmem>>, vector<1x8x32xf32>,
    %c0_26 = arith.constant 0 : index
    %c0_27 = arith.constant 0 : index
    %41 = vector.load %arg6[%c0_26, %c0_27] : memref<8x32xf32, #tpu.memory_space<vmem>>, vector<8x32xf32>
    tpu.vector_store %arg6[%c0_26, %c0_27], %37 {strides = array<i32>} : memref<8x32xf32, #tpu.memory_space<vmem>>, vector<8x32xf32>,
    return
  }
  func.func @transform_0(%arg0: i32) -> (i32, i32, i32) {
    %c0_i32 = arith.constant 0 : i32
    %c0_i32_0 = arith.constant 0 : i32
    %c0_i32_1 = arith.constant 0 : i32
    return %arg0, %c0_i32, %c0_i32_0 : i32, i32, i32
  }
  func.func @transform_1(%arg0: i32) -> (i32, i32, i32) {
    %c0_i32 = arith.constant 0 : i32
    %c0_i32_0 = arith.constant 0 : i32
    %c0_i32_1 = arith.constant 0 : i32
    %c0_i32_2 = arith.constant 0 : i32
    return %c0_i32, %c0_i32_0, %c0_i32_1 : i32, i32, i32
  }
  func.func @transform_2(%arg0: i32) -> (i32, i32) {
    %c0_i32 = arith.constant 0 : i32
    %c0_i32_0 = arith.constant 0 : i32
    %c0_i32_1 = arith.constant 0 : i32
    return %c0_i32, %c0_i32_0 : i32, i32
  }
  func.func @transform_3(%arg0: i32) -> (i32, i32) {
    %c0_i32 = arith.constant 0 : i32
    %c0_i32_0 = arith.constant 0 : i32
    %c0_i32_1 = arith.constant 0 : i32
    return %c0_i32, %c0_i32_0 : i32, i32
  }
  func.func @transform_4(%arg0: i32) -> (i32, i32, i32) {
    %c0_i32 = arith.constant 0 : i32
    %c0_i32_0 = arith.constant 0 : i32
    %c0_i32_1 = arith.constant 0 : i32
    return %arg0, %c0_i32, %c0_i32_0 : i32, i32, i32
  }
}

</mosaic_0001>

<bundles_post_ra>
// kernel: urnn_forward.1
= control target key start
LH: loop header
LB: loop body
LE: loop exit
PB: predicated region body
PF: predicated region fallthrough
CT: control target
= control target key end

     0   :  { %9 = vsyncpa [#allocation4], 0  ;;  %s1441_s0 = inlined_call_operand.hbm [shape: f32[8,8,32], index: 0, kind: input, shape index: {}]   ;;  %s1442_s1 = inlined_call_operand.hbm [shape: f32[1,8,32], index: 1, kind: input, shape index: {}]   ;;  %s1443_s2 = inlined_call_operand.hbm [shape: f32[32,32], index: 2, kind: input, shape index: {}]   ;;  %s1444_s3 = inlined_call_operand.hbm [shape: f32[32,32], index: 3, kind: input, shape index: {}]   ;;  %s1445_s4 = inlined_call_operand.vmem [shape: f32[8,8,32], index: 4, kind: output, shape index: {}]  }
   0x1   :  { %11 = vsyncpa [#allocation4 + $0x1], 0 }
   0x2   :  { %12 = vsyncpa [#allocation6], 0 }
   0x3   :  { %13 = vsyncpa [#allocation9], 0  ;;  %s1201_s15 = smov 0   ;;  %s1203_s16 = smov 0  }
   0x4   :  { %s1205_s17 = smov 0   ;;  %s1207_s18 = smov 0  }
   0x5 LB: > { %s1220_s19 = sadd.s32 4294967295, %s1165_s18   ;;  %p39_p0 = scmp.ne.s32.totalorder %s1157_s16, %s1153_s15  ;;  %s1165_s18 = sphi %s1207_s18, %s1464_s18   ;;  %s1161_s17 = sphi %s1205_s17, %s1463_s17   ;;  %s1157_s16 = sphi %s1203_s16, %s1462_s16   ;;  %s1153_s15 = sphi %s1201_s15, %s1461_s15  }
   0x6   : > { %p1446_p1 = scmp.eq.s32.totalorder %s1220_s19, 0  ;;  %p786_p2 = scmp.ge.s32.totalorder %s1165_s18, 1 }
   0x7   : > { %p139_p3 = scmp.lt.s32.totalorder %s1165_s18, 3  ;;  %s1167_s22 = smov [#allocation5]  }
   0x8   : > { %p1229_p5 = por %p1446_p1, %p39_p0  ;;  %s152_s23 = sshll.u32 %s1167_s22, 4  ;;  %s153_s23 = int_to_ptr.vmem [resolvable:$true] %s152_s23 }
   0x9   : > { %p1233_p6 = pnand %p786_p2, %p139_p3  ;;  %s1168_s24 = smov [#allocation7]  }
   0xa   : > { %s1449_s20 = scalar_select %p1229_p5, 1, 0 }
   0xb   : > { %s1450_s21 = scalar_select %p1233_p6, 1, 0 }
   0xc   : > { %p948_p7 = pneg %p1233_p6  ;;  %s162_s25 = sshll.u32 %s1168_s24, 4  ;;  %s1245_s25 = int_to_ptr.vmem [resolvable:$true] %s162_s25 }
   0xd   : > { %s1169_s27 = smov [#allocation8]   ;;  %s1009_s5 = scalar_lea.hbm %s1442_s1, 128 }
   0xe   : > { %p1241_p8 = pnand %p948_p7, %p1446_p1  ;;  %s1247_s28 = sshll.u32 %s1169_s27, 4  ;;  %s176_s28 = int_to_ptr.vmem [resolvable:$true] %s1247_s28 }
   0xf   : > { %p1010_p9 = scmp.ne.s32.totalorder %s1442_s1, %s1009_s5  ;;  %p1016_p13 = scmp.lt.u32.totalorder %s1009_s5, %s1442_s1 }
  0x10   : > { %p1257_p10 = pneg %p1241_p8 }
  0x12   : > { %p1012_p11 = pnand %p1257_p10, %p1010_p9 }
  0x14   : > { %p1013_p12 = pneg %p1012_p11 }
  0x16   : > { %p1018_p0 = pnand %p1016_p13, %p1013_p12 }
  0x18   : > { %1021 = shalt.err (!%p1018_p0)
}
  0x19   : > { %s1022_s11 = scalar_lea.vmem %s153_s23, 128  ;;  %p1030_p4 = scmp.lt.s32.totalorder %s153_s23, %s153_s23 }
  0x1a   : > { %p1023_p2 = scmp.ne.s32.totalorder %s153_s23, %s1022_s11  ;;  %p1031_p1 = scmp.lt.s32.totalorder %s1022_s11, %s1022_s11 }
  0x1c   : > { %p1025_p3 = pnand %p1023_p2, %p1257_p10  ;;  %p1032_p5 = por %p1031_p1, %p1030_p4 }
  0x1e   : > { %p1026_p7 = pneg %p1025_p3 }
  0x20   : > { %p1033_p6 = pnand %p1032_p5, %p1026_p7 }
  0x22   : > { %1036 = shalt.err (!%p1033_p6)
}
  0x23   : > { %951 = dma.hbm_to_vmem [thread:$0]  (!%p1241_p8), %s1442_s1, 128, %s153_s23, [#allocation6]  }
  0x24   : > { %s1037_s22 = scalar_lea.hbm %s1443_s2, 512 }
  0x25   : > { %p1038_p9 = scmp.ne.s32.totalorder %s1443_s2, %s1037_s22  ;;  %p1044_p4 = scmp.lt.u32.totalorder %s1037_s22, %s1443_s2 }
  0x27   : > { %p1040_p11 = pnand %p1038_p9, %p1257_p10 }
  0x29   : > { %p1041_p1 = pneg %p1040_p11 }
  0x2b   : > { %p1046_p5 = pnand %p1044_p4, %p1041_p1 }
  0x2d   : > { %1049 = shalt.err (!%p1046_p5)
}
  0x2e   : > { %s1050_s23 = scalar_lea.vmem %s1245_s25, 512  ;;  %p1058_p0 = scmp.lt.s32.totalorder %s1245_s25, %s1245_s25 }
  0x2f   : > { %p1051_p6 = scmp.ne.s32.totalorder %s1245_s25, %s1050_s23  ;;  %p1059_p2 = scmp.lt.s32.totalorder %s1050_s23, %s1050_s23 }
  0x31   : > { %p1053_p12 = pnand %p1051_p6, %p1257_p10  ;;  %p1060_p3 = por %p1059_p2, %p1058_p0 }
  0x33   : > { %p1054_p13 = pneg %p1053_p12 }
  0x35   : > { %p1061_p7 = pnand %p1060_p3, %p1054_p13 }
  0x37   : > { %1064 = shalt.err (!%p1061_p7)
}
  0x38   : > { %s1170_s5 = smov 128   ;;  %s1171_s6 = smov 8  }
  0x39   : > { %954 = dma.hbm_to_vmem [thread:$0]  (!%p1241_p8), %s1443_s2, 512, %s1245_s25, [#allocation6], %s1170_s5, %s1170_s5, %s1171_s6  }
  0x3a   : > { %s1065_s12 = scalar_lea.hbm %s1444_s3, 512 }
  0x3b   : > { %p1066_p9 = scmp.ne.s32.totalorder %s1444_s3, %s1065_s12  ;;  %p1072_p4 = scmp.lt.u32.totalorder %s1065_s12, %s1444_s3 }
  0x3d   : > { %p1068_p11 = pnand %p1066_p9, %p1257_p10 }
  0x3f   : > { %p1069_p1 = pneg %p1068_p11 }
  0x41   : > { %p1074_p5 = pnand %p1072_p4, %p1069_p1 }
  0x43   : > { %1077 = shalt.err (!%p1074_p5)
}
  0x44   : > { %s1078_s24 = scalar_lea.vmem %s176_s28, 512  ;;  %p1086_p0 = scmp.lt.s32.totalorder %s176_s28, %s176_s28 }
  0x45   : > { %p1079_p6 = scmp.ne.s32.totalorder %s176_s28, %s1078_s24  ;;  %p1087_p2 = scmp.lt.s32.totalorder %s1078_s24, %s1078_s24 }
  0x47   : > { %p1081_p12 = pnand %p1079_p6, %p1257_p10  ;;  %p1088_p3 = por %p1087_p2, %p1086_p0 }
  0x49   : > { %p1082_p13 = pneg %p1081_p12 }
  0x4b   : > { %p1089_p7 = pnand %p1088_p3, %p1082_p13 }
  0x4d   : > { %1092 = shalt.err (!%p1089_p7)
}
  0x4e   : > { %957 = dma.hbm_to_vmem [thread:$0]  (!%p1241_p8), %s1444_s3, 512, %s176_s28, [#allocation9], %s1170_s5, %s1170_s5, %s1171_s6  }
  0x4f   : > { %s1322_s8 = sadd.s32 1, %s1165_s18   ;;  %s26_s29 = sadd.s32 1, %s1161_s17 }
  0x50   : > { %s23_s26 = ssub.s32 %s1165_s18, %s1322_s8  ;;  %p33_p9 = scmp.ne.s32.totalorder %s1161_s17, %s1157_s16 }
  0x51   : > { %p24_p10 = scmp.eq.s32.totalorder %s23_s26, 0  ;;  %p34_p11 = scmp.eq.s32.totalorder %s1165_s18, 0 }
  0x52   : > { %p965_p1 = scmp.lt.s32.totalorder %s1165_s18, 2  ;;  %s189_s23 = sand.u32 1, %s1161_s17  }
  0x53   : > { %s1332_s30 = scalar_select %p24_p10, %s1161_s17, %s26_s29  }
  0x54   : > { %p35_p4 = por %p34_p11, %p33_p9  ;;  %s791_s7 = sshll.u32 %s189_s23, 5 }
  0x55   : > { %s815_s9 = sshll.u32 %s1165_s18, 9  ;;  %s193_s28 = scalar_lea.vmem [#allocation3], %s791_s7 }
  0x56   : > { %s1339_s12 = scalar_lea.hbm %s1441_s0, %s815_s9  ;;  %s200_s13 = sshll.u32 %s193_s28, 4  ;;  %s1341_s13 = int_to_ptr.vmem [resolvable:$true] %s200_s13 }
  0x57   : > { %p1343_p8 = pnand %p965_p1, %p35_p4  ;;  %s1347_s18 = scalar_lea.sflag [#allocation4], %s189_s23 }
  0x58   : > { %s1093_s15 = scalar_lea.hbm %s1339_s12, 512  ;;  %s1098_s25 = scalar_lea.hbm %s1441_s0, 1024 }
  0x59   : > { %p1094_p5 = scmp.ne.s32.totalorder %s1339_s12, %s1093_s15  ;;  %p1095_p6 = pneg %p1343_p8 }
  0x5a   : > { %p1099_p0 = scmp.lt.u32.totalorder %s1339_s12, %s1441_s0  ;;  %p1100_p2 = scmp.lt.u32.totalorder %s1098_s25, %s1093_s15 }
  0x5b   : > { %p1096_p12 = pnand %p1095_p6, %p1094_p5  ;;  %p1102_p7 = scmp.lt.u32.totalorder %s1093_s15, %s1339_s12 }
  0x5c   : > { %p1101_p3 = por %p1100_p2, %p1099_p0 }
  0x5d   : > { %p1097_p13 = pneg %p1096_p12 }
  0x5e   : > { %p1103_p10 = por %p1102_p7, %p1101_p3 }
  0x60   : > { %p1104_p9 = pnand %p1103_p10, %p1097_p13 }
  0x62   : > { %1107 = shalt.err (!%p1104_p9)
}
  0x63   : > { %s1108_s29 = scalar_lea.vmem %s1341_s13, 512  ;;  %s1172_s23 = smov [#allocation3]  }
  0x64   : > { %p1109_p11 = scmp.ne.s32.totalorder %s1341_s13, %s1108_s29  ;;  %s1113_s7 = sshll.u32 %s1172_s23, 4  ;;  %s1114_s7 = int_to_ptr.vmem [resolvable:$false] %s1113_s7 }
  0x65   : > { %s1115_s9 = scalar_lea.vmem %s1114_s7, 1024  ;;  %p1116_p5 = scmp.lt.s32.totalorder %s1341_s13, %s1114_s7 }
  0x66   : > { %p1111_p1 = pnand %p1109_p11, %p1095_p6  ;;  %p1117_p12 = scmp.lt.s32.totalorder %s1115_s9, %s1108_s29 }
  0x68   : > { %p1112_p4 = pneg %p1111_p1  ;;  %p1118_p0 = por %p1117_p12, %p1116_p5 }
  0x6a   : > { %p1119_p2 = pnand %p1118_p0, %p1112_p4 }
  0x6c   : > { %1122 = shalt.err (!%p1119_p2)
}
  0x6d   : > { %961 = dma.hbm_to_vmem [thread:$0]  (!%p1343_p8), %s1339_s12, 512, %s1341_s13, %s1347_s18, %s1170_s5, %s1170_s5, %s1171_s6  }
  0x6e   : > { %p1454_p6 = scmp.ne.s32.totalorder %s1450_s21, 0 }
  0x6f   : > { %s214_s10 = sand.u32 (!%p1454_p6), 1, %s1157_s16   ;;  %p1455_p13 = scmp.ne.s32.totalorder (!%p1454_p6), %s1449_s20, 0 }
  0x70   : > { %212 = sbr.rel (%p1454_p6) target bundleno = 1012 (0x3f4), region = 36  ;;  %s795_s11 = sshll.u32 (!%p1454_p6), %s214_s10, 5 }
  0x71   : > { %s215_s28 = scalar_lea.sflag (!%p1454_p6), [#allocation4], %s214_s10  ;;  %s1381_s15 = scalar_lea.vmem (!%p1454_p6), [#allocation3], %s795_s11 }
  0x77   : > { %1140 = dma.done.wait (%p1455_p13), %s215_s28, 512  }
  0x78   : > { %1142 = vsyncadd (%p1455_p13), %s215_s28, 4294966784  ;;  %p1456_p3 = scmp.eq.s32.totalorder %s1220_s19, 0 }
  0x7a   : > { %1144 = dma.done.wait (%p1456_p3), [#allocation6], 640   ;;  %p1457_p8 = pmov %p1456_p3 }
  0x7b   : > { %p1458_p7 = pmov %p1456_p3 }
  0x7c   : > { %1146 = vsyncadd (%p1457_p8), [#allocation6], 4294966656 }
  0x7d   : > { %1148 = dma.done.wait (%p1458_p7), [#allocation9], 512   ;;  %p1459_p10 = pmov %p1456_p3 }
  0x7e   : > { %s799_s21 = sshll.u32 %s1220_s19, 2  ;;  %p1460_p11 = scmp.ne.s32.totalorder %s1220_s19, 0 }
  0x7f   : > { %1150 = vsyncadd (%p1459_p10), [#allocation9], 4294966784  ;;  %p257_p9 = scmp.lt.s32.totalorder %s799_s21, 7  ;;  %v266_v0 = vld [vmem:[#allocation5] sm:$0xff] (!%p1460_p11)  ;;  %vm267_vm0 = vcmask (!%p1460_p11), 261120  }
  0x80   : > { %265 = sbr.rel (%p1460_p11) target bundleno = 135 (0x87), region = 56  ;;  %268 = vst.msk [vmem:[#allocation2] sm:$0xff] (!%p1460_p11), %vm267_vm0, %v266_v0 }
  0x81   : > { %s1466_s21 = smov (!%p257_p9, %s799_s21), 7 }
  0x82   : > { %s800_s5 = sshll.u32 %s1466_s21, 3 }
  0x83   : > { %s1399_s12 = scalar_lea.vmem %s1445_s4, %s800_s5 }
  0x87 PF: > { %v273_v1 = vld [vmem:[#allocation7] sm:$0xff]  ;;  %v274_v2 = vld [vmem:[#allocation7 + $0x8] sm:$0xff]  ;;  %vm277_vm1 = vcmask 261120   ;;  %v1173_v5 = vmov 0.0|0.0   ;;  %v275_v7 = vld [vmem:[#allocation7 + $0x10] sm:$0xff]  ;;  %vm1174_vm2 = vmmov 0  }
  0x88   : > { %v375_v3 = vld [vmem:[#allocation8] sm:$0xff]  ;;  %v902_v4 = vpack.c.bf16 %v274_v2, %v273_v1  ;;  %910 = vmatprep.subr.bf16.mxu1 %v1173_v5  ;;  %v376_v6 = vld [vmem:[#allocation8 + $0x8] sm:$0xff]  ;;  %v276_v8 = vld [vmem:[#allocation7 + $0x18] sm:$0xff]  ;;  %v1175_v14 = vmov 0.0  }
  0x89   : > { %v911_v9 = vpack.c.bf16 %v376_v6, %v375_v3  ;;  %v906_v10 = vpack.c.bf16 %v276_v8, %v275_v7  ;;  %v377_v11 = vld [vmem:[#allocation8 + $0x10] sm:$0xff]  ;;  %v378_v12 = vld [vmem:[#allocation8 + $0x18] sm:$0xff]  ;;  %866 = vmatprep.mubr.msk.f32.mxu1 %vm1174_vm2, %v1175_v14  ;;  %v270_v16 = vld [vmem:[%s1381_s15 + $0x8] sm:$0xff] }
  0x8a   : > { %v269_v13 = vld [vmem:[%s1381_s15] sm:$0xff]  ;;  %903 = vmatprep.subr.bf16.mxu0 %v902_v4  ;;  %v914_v15 = vpack.c.bf16 %v378_v12, %v377_v11  ;;  %v379_v17 = vld [vmem:[#allocation2] sm:$0xff]  ;;  %v271_v18 = vld [vmem:[%s1381_s15 + $0x10] sm:$0xff] }
  0x8b   : > { %852 = vmatprep.mubr.msk.f32.mxu0 %vm277_vm1, %v269_v13  ;;  %905 = vmatpush3.bf16.msra.mxu0 %v902_v4  ;;  %v272_v19 = vld [vmem:[%s1381_s15 + $0x18] sm:$0xff] }
  0x8c   : > { %912 = vmatpush3.bf16.msra.mxu1 %v911_v9  ;;  %907 = vmatprep.subr.bf16.mxu0 %v906_v10 }
  0x8d   : > { %913 = vmatprep.subr.bf16.mxu1 %v1173_v5 }
  0x8f   : > { %909 = vmatpush3.bf16.msra.mxu0 %v906_v10 }
  0x90   : > { %915 = vmatpush3.bf16.msra.mxu1 %v914_v15  ;;  %916 = vmatprep.subr.bf16.mxu0 %v1173_v5 }
  0x91   : > { %922 = vmatprep.subr.bf16.mxu1 %v1173_v5 }
  0x92   : > { %853 = vmatmul.mubr.msk.f32.vlgmr.msra.gmra.mrb[0].mxu0 %vm277_vm1, %v270_v16 }
  0x93   : > { %867 = vmatmul.mubr.msk.f32.vlgmr.msra.gmra.mrb[0].mxu1 %vm277_vm1, %v379_v17  ;;  %918 = vmatpush3.bf16.msra.mxu0 %v911_v9 }
  0x94   : > { %924 = vmatpush3.bf16.msra.mxu1 %v911_v9  ;;  %919 = vmatprep.subr.bf16.mxu0 %v1173_v5 }
  0x95   : > { %925 = vmatprep.subr.bf16.mxu1 %v1173_v5  ;;  %888 = vmatprep.mubr.msk.f32.mxu1 %vm1174_vm2, %v1175_v14 }
  0x96   : > { %855 = vmatprep.mubr.msk.f32.mxu0 %vm277_vm1, %v271_v18 }
  0x97   : > { %921 = vmatpush3.bf16.msra.mxu0 %v914_v15 }
  0x98   : > { %927 = vmatpush3.bf16.msra.mxu1 %v914_v15  ;;  %928 = vmatprep.subr.bf16.mxu0 %v1173_v5 }
  0x99   : > { %856 = vmatmul.mubr.msk.f32.gmra.mrb[2].mxu0 %vm277_vm1, %v272_v19 }
  0x9a   : > { %877 = vmatprep.mubr.msk.f32.mxu0 %vm1174_vm2, %v1175_v14 }
 0x165   : > { %v854_v20 = vpop.f32.mrb[0].mxu0 }
 0x166   : > { %v449_v21 = vpop.f32.mrb[0].mxu1  ;;  %v356_v22 = vpop.f32.mrb[1].mxu0 }
 0x167   : > { %v868_v23 = vpop.f32.mrb[1].mxu1  ;;  %v453_v24 = vadd.f32 %v449_v21, %v356_v22 }
 0x169   : > { %v454_v25 = vmax.f32 %v453_v24, 0.0 }
 0x16b   : > { %455 = vst.msk [vmem:[%s1399_s12] sm:$0xff] %vm277_vm1, %v454_v25  ;;  %878 = vmatmul.mubr.msk.f32.vlgmr.msra.gmra.mrb[4].mxu0 %vm277_vm1, %v454_v25 }
 0x16c   : > { %930 = vmatpush3.bf16.msra.mxu0 %v911_v9  ;;  %899 = vmatprep.mubr.msk.f32.mxu0 %vm1174_vm2, %v1175_v14  ;;  %v857_v26 = vpop.f32.mrb[2].mxu0 }
 0x16d   : > { %931 = vmatprep.subr.bf16.mxu0 %v1173_v5  ;;  %v366_v27 = vpop.f32.mrb[3].mxu0 }
 0x170   : > { %933 = vmatpush3.bf16.msra.mxu0 %v914_v15 }
 0x23e   : > { %v525_v28 = vpop.f32.mrb[4].mxu0 }
 0x23f   : > { %v529_v29 = vadd.f32 %v854_v20, %v525_v28  ;;  %v879_v30 = vpop.f32.mrb[5].mxu0 }
 0x241   : > { %v530_v31 = vmax.f32 %v529_v29, 0.0 }
 0x243   : > { %808 = vst.msk [vmem:[%s1399_s12 + $0x8] sm:$0xff] %vm277_vm1, %v530_v31  ;;  %889 = vmatmul.mubr.msk.f32.vlgmr.msra.gmra.mrb[2].mxu1 %vm277_vm1, %v530_v31 }
 0x316   : > { %v602_v32 = vpop.f32.mrb[2].mxu1 }
 0x317   : > { %v606_v33 = vadd.f32 %v602_v32, %v366_v27  ;;  %v890_v34 = vpop.f32.mrb[3].mxu1 }
 0x319   : > { %v607_v35 = vmax.f32 %v606_v33, 0.0 }
 0x31b   : > { %810 = vst.msk [vmem:[%s1399_s12 + $0x10] sm:$0xff] %vm277_vm1, %v607_v35  ;;  %900 = vmatmul.mubr.msk.f32.vlgmr.msra.gmra.mrb[6].mxu0 %vm277_vm1, %v607_v35 }
 0x3ee   : > { %v679_v36 = vpop.f32.mrb[6].mxu0 }
 0x3ef   : > { %v683_v37 = vadd.f32 %v857_v26, %v679_v36  ;;  %v901_v38 = vpop.f32.mrb[7].mxu0 }
 0x3f1   : > { %v684_v39 = vmax.f32 %v683_v37, 0.0 }
 0x3f3   : > { %812 = vst.msk [vmem:[%s1399_s12 + $0x18] sm:$0xff] %vm277_vm1, %v684_v39  ;;  %687 = vst.msk [vmem:[#allocation2] sm:$0xff] %vm277_vm1, %v684_v39 }
 0x3f4 PF: > { %p16_p1 = scmp.ge.s32.totalorder %s1322_s8, 4   ;;  %s1461_s15 = smov %s1157_s16 }
 0x3f5   : > { %s1462_s16 = smov %s1161_s17  ;;  %s1463_s17 = smov %s1332_s30 }
 0x3f6   : > { %s1464_s18 = smov %s1322_s8  ;;  %18 = sbr.rel (!%p16_p1) target bundleno = 5 (0x5), region = 95 }
 0x3fd   :  { %710 = vsyncpa [#allocation4], 1 }
 0x3fe   :  { %712 = vsyncpa [#allocation4 + $0x1], 1 }
 0x3ff   :  { %713 = vsyncpa [#allocation6], 1 }
 0x400   :  { %714 = vsyncpa [#allocation9], 1 }

</bundles_post_ra>
